<compile_context>
chip_gen: v7x
topology: tpu7x:2x2x1
jax: 0.10.0
libtpu: 0.0.40
codegen_flags: <defaults>
</compile_context>

<pallas_src>
import functools

import jax
import jax.numpy as jnp
from jax.experimental import pallas as pl
from jax.experimental.pallas import tpu as pltpu

EPS = 1e-5


def _torus_conv_bn_kernel(x_ref, col_ref, w_ref, b_ref, g_ref, be_ref, o_ref,
                          patch_ref, acc_ref, *, width, kh, kw, use_bn):
    """Torus conv + (optional) training-mode BatchNorm2d.

    x_ref:     (B, Cin, H*W)        f32, spatial flattened onto lanes
    col_ref:   (1, 1, H*W)          i32, column index (x mod W) per lane
    w_ref:     (Cout, kh*kw*Cin)    bf16, rows ordered (ky, kx, cin)
    b_ref:     (1, Cout, 1)         f32 conv bias
    g_ref/be_ref: (1, Cout, 1)      f32 BN gamma / beta
    o_ref:     (B, Cout, H*W)       f32
    patch_ref: (B, kh*kw*Cin, H*W)  bf16 VMEM scratch (im2col staging)
    acc_ref:   (B, Cout, H*W)       f32 VMEM scratch (conv accumulator)
    """
    B, cin, hw = x_ref.shape
    cout = w_ref.shape[0]
    eh, ew = kh // 2, kw // 2

    # Cast once to bf16; all tap building / matmul operands are bf16.
    xb = x_ref[...].astype(jnp.bfloat16)
    col = col_ref[...]                                   # (1, 1, hw) i32

    def shift_w(a, dx):
        # Torus shift along W inside the flattened H*W lane axis:
        # main roll is correct except at the dx wrap columns, fixed by a select.
        if dx == 0:
            return a
        main = jnp.roll(a, -dx, axis=2)
        wrap = jnp.roll(a, -dx + (width if dx > 0 else -width), axis=2)
        edge = (col >= width - dx) if dx > 0 else (col < -dx)
        return jnp.where(edge, wrap, main)

    # im2col: stage the (ky, kx, cin)-ordered taps into the reused VMEM scratch
    # (slice stores, full-lane pieces -- no lane-axis concatenate).
    t = 0
    for dy in range(-eh, eh + 1):
        # H shift: rolling the per-sample H*W axis by dy*W wraps rows correctly.
        hy = xb if dy == 0 else jnp.roll(xb, -dy * width, axis=2)
        for dx in range(-ew, ew + 1):
            patch_ref[:, t * cin:(t + 1) * cin, :] = shift_w(hy, dx)
            t += 1

    # One fused MXU matmul per sample: (Cout, K*Cin) @ (K*Cin, H*W), N lane-dense,
    # bf16 operands, f32 accumulation.  Conv bias added in f32.
    bias = b_ref[0]                                      # (Cout, 1) f32
    for b in range(B):
        acc_ref[b] = jnp.dot(w_ref[...], patch_ref[b],
                             preferred_element_type=jnp.float32) + bias

    acc = acc_ref[...]                                   # (B, Cout, hw) f32
    if use_bn:
        # Training-mode BatchNorm2d: one-pass batch stats over (batch, spatial),
        # biased variance, clamped at 0, folded into a per-channel scale/shift.
        inv_n = 1.0 / (B * hw)
        s1 = jnp.sum(jnp.sum(acc, axis=2, keepdims=True), axis=0, keepdims=True)
        s2 = jnp.sum(jnp.sum(acc * acc, axis=2, keepdims=True), axis=0,
                     keepdims=True)
        mean = s1 * inv_n
        var = jnp.maximum(s2 * inv_n - mean * mean, 0.0)
        scale = g_ref[...] * jax.lax.rsqrt(var + EPS)    # (1, Cout, 1)
        shift = be_ref[...] - mean * scale
        o_ref[...] = acc * scale + shift
    else:
        o_ref[...] = acc


# ----------------------------- wrapper / reference --------------------------

def torus_conv2d_forward(x_nchw, weight, bias, gamma=None, beta=None, bn=True):
    """Pallas forward of TorusConv2d(input_dim, output_dim, kernel_size, bn)."""
    B, cin, H, W = x_nchw.shape
    cout, _, kh, kw = weight.shape
    HW = H * W

    x3 = x_nchw.reshape(B, cin, HW).astype(jnp.float32)
    col = (jnp.arange(HW, dtype=jnp.int32) % W).reshape(1, 1, HW)
    # (out, in, kh, kw) -> (out, kh, kw, in) -> (out, kh*kw*in): row order (ky, kx, cin)
    # matches the tap staging order inside the kernel; bf16 MXU operand.
    w_im2col = (jnp.transpose(weight, (0, 2, 3, 1))
                .reshape(cout, kh * kw * cin).astype(jnp.bfloat16))
    b3 = bias.reshape(1, cout, 1).astype(jnp.float32)
    g3 = (jnp.ones((cout,), jnp.float32) if gamma is None else gamma).reshape(1, cout, 1)
    be3 = (jnp.zeros((cout,), jnp.float32) if beta is None else beta).reshape(1, cout, 1)

    kernel = functools.partial(_torus_conv_bn_kernel,
                               width=W, kh=kh, kw=kw, use_bn=bn)
    vmem = pl.BlockSpec(memory_space=pltpu.MemorySpace.VMEM)
    cost = pl.CostEstimate(
        flops=2 * B * HW * (kh * kw * cin) * cout,
        transcendentals=cout,
        bytes_accessed=(x3.size * 4 + col.size * 4 + w_im2col.size * 2
                        + 3 * cout * 4 + B * cout * HW * 4))

    out = pl.pallas_call(
        kernel,
        out_shape=jax.ShapeDtypeStruct((B, cout, HW), jnp.float32),
        in_specs=[vmem] * 6,
        out_specs=vmem,
        scratch_shapes=[
            pltpu.VMEM((B, kh * kw * cin, HW), jnp.bfloat16),  # im2col patches
            pltpu.VMEM((B, cout, HW), jnp.float32),            # conv accumulator
        ],
        cost_estimate=cost,
    )(x3, col, w_im2col, b3, g3, be3)
    return out.reshape(B, cout, H, W)


def torus_conv2d_reference(x, weight, bias, gamma=None, beta=None, bn=True):
    """Plain-JAX (f32) transcription of the PyTorch TorusConv2d forward."""
    cout = weight.shape[0]
    kh, kw = weight.shape[2], weight.shape[3]
    eh, ew = kh // 2, kw // 2
    h = jnp.concatenate([x[:, :, :, -ew:], x, x[:, :, :, :ew]], axis=3)
    h = jnp.concatenate([h[:, :, -eh:], h, h[:, :, :eh]], axis=2)
    h = jax.lax.conv_general_dilated(
        h, weight, window_strides=(1, 1), padding="VALID",
        dimension_numbers=("NCHW", "OIHW", "NCHW"))
    h = h + bias.reshape(1, cout, 1, 1)
    if not bn:
        return h
    g = jnp.ones((cout,), jnp.float32) if gamma is None else gamma
    be = jnp.zeros((cout,), jnp.float32) if beta is None else beta
    mean = jnp.mean(h, axis=(0, 2, 3), keepdims=True)
    var = jnp.var(h, axis=(0, 2, 3), keepdims=True)      # biased, BN training mode
    return (g.reshape(1, cout, 1, 1) * (h - mean) * jax.lax.rsqrt(var + EPS)
            + be.reshape(1, cout, 1, 1))


if __name__ == "__main__":
    key = jax.random.PRNGKey(0)
    kx, kw_, kb, kg, kbe = jax.random.split(key, 5)

    # Shapes as used by GeeseNet's conv0: TorusConv2d(4, 32, (3, 3), True) on 16x16.
    B, CIN, H, W, COUT = 2, 4, 16, 16, 32
    x = jax.random.normal(kx, (B, CIN, H, W), jnp.float32)
    weight = 0.1 * jax.random.normal(kw_, (COUT, CIN, 3, 3), jnp.float32)
    bias = 0.1 * jax.random.normal(kb, (COUT,), jnp.float32)
    gamma = 1.0 + 0.1 * jax.random.normal(kg, (COUT,), jnp.float32)
    beta = 0.1 * jax.random.normal(kbe, (COUT,), jnp.float32)

    # bn=True path (the one GeeseNet uses)
    out = torus_conv2d_forward(x, weight, bias, gamma, beta, bn=True)
    jax.block_until_ready(out)
    ref = torus_conv2d_reference(x, weight, bias, gamma, beta, bn=True)
    assert out.shape == (B, COUT, H, W)
    # Tolerance covers the bf16 operand rounding (outputs are BN-normalized, ~O(1)).
    assert jnp.allclose(out, ref, atol=3e-2, rtol=3e-2), \
        float(jnp.max(jnp.abs(out - ref)))

    # bn=False path (conv + bias only)
    out_nb = torus_conv2d_forward(x, weight, bias, bn=False)
    jax.block_until_ready(out_nb)
    ref_nb = torus_conv2d_reference(x, weight, bias, bn=False)
    assert jnp.allclose(out_nb, ref_nb, atol=3e-2, rtol=3e-2), \
        float(jnp.max(jnp.abs(out_nb - ref_nb)))

    print("KERNEL_OK")
</pallas_src>

<mosaic_0001>
module attributes {stable_mosaic.version = 11 : i64} {
  func.func @_torus_conv_bn_kernel(%arg0: memref<2x4x256xf32, #tpu.memory_space<vmem>>, %arg1: memref<1x1x256xi32, #tpu.memory_space<vmem>>, %arg2: memref<32x36xbf16, #tpu.memory_space<vmem>>, %arg3: memref<1x32x1xf32, #tpu.memory_space<vmem>>, %arg4: memref<1x32x1xf32, #tpu.memory_space<vmem>>, %arg5: memref<1x32x1xf32, #tpu.memory_space<vmem>>, %arg6: memref<2x32x256xf32, #tpu.memory_space<vmem>>, %arg7: memref<2x36x256xbf16, #tpu.memory_space<vmem>>, %arg8: memref<2x32x256xf32, #tpu.memory_space<vmem>>) attributes {dimension_semantics = [], scalar_prefetch = 0 : i64, scratch_operands = 2 : i64, tpu.core_type = #tpu.core_type<tc>} {
    %c0 = arith.constant 0 : index
    %c0_0 = arith.constant 0 : index
    %c0_1 = arith.constant 0 : index
    %0 = vector.load %arg0[%c0, %c0_0, %c0_1] : memref<2x4x256xf32, #tpu.memory_space<vmem>>, vector<2x4x256xf32>
    %1 = arith.truncf %0 : vector<2x4x256xf32> to vector<2x4x256xbf16>
    %c0_2 = arith.constant 0 : index
    %c0_3 = arith.constant 0 : index
    %c0_4 = arith.constant 0 : index
    %2 = vector.load %arg1[%c0_2, %c0_3, %c0_4] : memref<1x1x256xi32, #tpu.memory_space<vmem>>, vector<1x1x256xi32>
    %3 = vector.extract_strided_slice %1 {offsets = [0, 0, 240], sizes = [2, 4, 16], strides = [1, 1, 1]} : vector<2x4x256xbf16> to vector<2x4x16xbf16>
    %4 = vector.extract_strided_slice %1 {offsets = [0, 0, 0], sizes = [2, 4, 240], strides = [1, 1, 1]} : vector<2x4x256xbf16> to vector<2x4x240xbf16>
    %5 = tpu.concatenate %3, %4 in 2 : vector<2x4x16xbf16>, vector<2x4x240xbf16> -> vector<2x4x256xbf16>
    %6 = vector.extract_strided_slice %5 {offsets = [0, 0, 255], sizes = [2, 4, 1], strides = [1, 1, 1]} : vector<2x4x256xbf16> to vector<2x4x1xbf16>
    %7 = vector.extract_strided_slice %5 {offsets = [0, 0, 0], sizes = [2, 4, 255], strides = [1, 1, 1]} : vector<2x4x256xbf16> to vector<2x4x255xbf16>
    %8 = tpu.concatenate %6, %7 in 2 : vector<2x4x1xbf16>, vector<2x4x255xbf16> -> vector<2x4x256xbf16>
    %9 = vector.extract_strided_slice %5 {offsets = [0, 0, 15], sizes = [2, 4, 241], strides = [1, 1, 1]} : vector<2x4x256xbf16> to vector<2x4x241xbf16>
    %10 = vector.extract_strided_slice %5 {offsets = [0, 0, 0], sizes = [2, 4, 15], strides = [1, 1, 1]} : vector<2x4x256xbf16> to vector<2x4x15xbf16>
    %11 = tpu.concatenate %9, %10 in 2 : vector<2x4x241xbf16>, vector<2x4x15xbf16> -> vector<2x4x256xbf16>
    %c1_i32 = arith.constant 1 : i32
    %12 = vector.broadcast %c1_i32 : i32 to vector<1x1x256xi32>
    %13 = arith.cmpi slt, %2, %12 : vector<1x1x256xi32>
    %14 = vector.shape_cast %13 : vector<1x1x256xi1> to vector<1x1x256xi1>
    %15 = vector.broadcast %14 : vector<1x1x256xi1> to vector<2x4x256xi1>
    %16 = arith.select %15, %11, %8 : vector<2x4x256xi1>, vector<2x4x256xbf16>
    %c0_5 = arith.constant 0 : index
    %c0_6 = arith.constant 0 : index
    %c0_7 = arith.constant 0 : index
    %17 = vector.load %arg7[%c0_5, %c0_6, %c0_7] : memref<2x36x256xbf16, #tpu.memory_space<vmem>>, vector<2x4x256xbf16>
    tpu.vector_store %arg7[%c0_5, %c0_6, %c0_7], %16 {strides = array<i32>} : memref<2x36x256xbf16, #tpu.memory_space<vmem>>, vector<2x4x256xbf16>,
    %c0_8 = arith.constant 0 : index
    %c4 = arith.constant 4 : index
    %c0_9 = arith.constant 0 : index
    %18 = vector.load %arg7[%c0_8, %c4, %c0_9] : memref<2x36x256xbf16, #tpu.memory_space<vmem>>, vector<2x4x256xbf16>
    tpu.vector_store %arg7[%c0_8, %c4, %c0_9], %5 {strides = array<i32>} : memref<2x36x256xbf16, #tpu.memory_space<vmem>>, vector<2x4x256xbf16>,
    %19 = vector.extract_strided_slice %5 {offsets = [0, 0, 1], sizes = [2, 4, 255], strides = [1, 1, 1]} : vector<2x4x256xbf16> to vector<2x4x255xbf16>
    %20 = vector.extract_strided_slice %5 {offsets = [0, 0, 0], sizes = [2, 4, 1], strides = [1, 1, 1]} : vector<2x4x256xbf16> to vector<2x4x1xbf16>
    %21 = tpu.concatenate %19, %20 in 2 : vector<2x4x255xbf16>, vector<2x4x1xbf16> -> vector<2x4x256xbf16>
    %22 = vector.extract_strided_slice %5 {offsets = [0, 0, 241], sizes = [2, 4, 15], strides = [1, 1, 1]} : vector<2x4x256xbf16> to vector<2x4x15xbf16>
    %23 = vector.extract_strided_slice %5 {offsets = [0, 0, 0], sizes = [2, 4, 241], strides = [1, 1, 1]} : vector<2x4x256xbf16> to vector<2x4x241xbf16>
    %24 = tpu.concatenate %22, %23 in 2 : vector<2x4x15xbf16>, vector<2x4x241xbf16> -> vector<2x4x256xbf16>
    %c15_i32 = arith.constant 15 : i32
    %25 = vector.broadcast %c15_i32 : i32 to vector<1x1x256xi32>
    %26 = arith.cmpi sge, %2, %25 : vector<1x1x256xi32>
    %27 = vector.shape_cast %26 : vector<1x1x256xi1> to vector<1x1x256xi1>
    %28 = vector.broadcast %27 : vector<1x1x256xi1> to vector<2x4x256xi1>
    %29 = arith.select %28, %24, %21 : vector<2x4x256xi1>, vector<2x4x256xbf16>
    %c0_10 = arith.constant 0 : index
    %c8 = arith.constant 8 : index
    %c0_11 = arith.constant 0 : index
    %30 = vector.load %arg7[%c0_10, %c8, %c0_11] : memref<2x36x256xbf16, #tpu.memory_space<vmem>>, vector<2x4x256xbf16>
    tpu.vector_store %arg7[%c0_10, %c8, %c0_11], %29 {strides = array<i32>} : memref<2x36x256xbf16, #tpu.memory_space<vmem>>, vector<2x4x256xbf16>,
    %31 = vector.extract_strided_slice %1 {offsets = [0, 0, 255], sizes = [2, 4, 1], strides = [1, 1, 1]} : vector<2x4x256xbf16> to vector<2x4x1xbf16>
    %32 = vector.extract_strided_slice %1 {offsets = [0, 0, 0], sizes = [2, 4, 255], strides = [1, 1, 1]} : vector<2x4x256xbf16> to vector<2x4x255xbf16>
    %33 = tpu.concatenate %31, %32 in 2 : vector<2x4x1xbf16>, vector<2x4x255xbf16> -> vector<2x4x256xbf16>
    %34 = vector.extract_strided_slice %1 {offsets = [0, 0, 15], sizes = [2, 4, 241], strides = [1, 1, 1]} : vector<2x4x256xbf16> to vector<2x4x241xbf16>
    %35 = vector.extract_strided_slice %1 {offsets = [0, 0, 0], sizes = [2, 4, 15], strides = [1, 1, 1]} : vector<2x4x256xbf16> to vector<2x4x15xbf16>
    %36 = tpu.concatenate %34, %35 in 2 : vector<2x4x241xbf16>, vector<2x4x15xbf16> -> vector<2x4x256xbf16>
    %c1_i32_12 = arith.constant 1 : i32
    %37 = vector.broadcast %c1_i32_12 : i32 to vector<1x1x256xi32>
    %38 = arith.cmpi slt, %2, %37 : vector<1x1x256xi32>
    %39 = vector.shape_cast %38 : vector<1x1x256xi1> to vector<1x1x256xi1>
    %40 = vector.broadcast %39 : vector<1x1x256xi1> to vector<2x4x256xi1>
    %41 = arith.select %40, %36, %33 : vector<2x4x256xi1>, vector<2x4x256xbf16>
    %c0_13 = arith.constant 0 : index
    %c12 = arith.constant 12 : index
    %c0_14 = arith.constant 0 : index
    %42 = vector.load %arg7[%c0_13, %c12, %c0_14] : memref<2x36x256xbf16, #tpu.memory_space<vmem>>, vector<2x4x256xbf16>
    tpu.vector_store %arg7[%c0_13, %c12, %c0_14], %41 {strides = array<i32>} : memref<2x36x256xbf16, #tpu.memory_space<vmem>>, vector<2x4x256xbf16>,
    %c0_15 = arith.constant 0 : index
    %c16 = arith.constant 16 : index
    %c0_16 = arith.constant 0 : index
    %43 = vector.load %arg7[%c0_15, %c16, %c0_16] : memref<2x36x256xbf16, #tpu.memory_space<vmem>>, vector<2x4x256xbf16>
    tpu.vector_store %arg7[%c0_15, %c16, %c0_16], %1 {strides = array<i32>} : memref<2x36x256xbf16, #tpu.memory_space<vmem>>, vector<2x4x256xbf16>,
    %44 = vector.extract_strided_slice %1 {offsets = [0, 0, 1], sizes = [2, 4, 255], strides = [1, 1, 1]} : vector<2x4x256xbf16> to vector<2x4x255xbf16>
    %45 = vector.extract_strided_slice %1 {offsets = [0, 0, 0], sizes = [2, 4, 1], strides = [1, 1, 1]} : vector<2x4x256xbf16> to vector<2x4x1xbf16>
    %46 = tpu.concatenate %44, %45 in 2 : vector<2x4x255xbf16>, vector<2x4x1xbf16> -> vector<2x4x256xbf16>
    %47 = vector.extract_strided_slice %1 {offsets = [0, 0, 241], sizes = [2, 4, 15], strides = [1, 1, 1]} : vector<2x4x256xbf16> to vector<2x4x15xbf16>
    %48 = vector.extract_strided_slice %1 {offsets = [0, 0, 0], sizes = [2, 4, 241], strides = [1, 1, 1]} : vector<2x4x256xbf16> to vector<2x4x241xbf16>
    %49 = tpu.concatenate %47, %48 in 2 : vector<2x4x15xbf16>, vector<2x4x241xbf16> -> vector<2x4x256xbf16>
    %c15_i32_17 = arith.constant 15 : i32
    %50 = vector.broadcast %c15_i32_17 : i32 to vector<1x1x256xi32>
    %51 = arith.cmpi sge, %2, %50 : vector<1x1x256xi32>
    %52 = vector.shape_cast %51 : vector<1x1x256xi1> to vector<1x1x256xi1>
    %53 = vector.broadcast %52 : vector<1x1x256xi1> to vector<2x4x256xi1>
    %54 = arith.select %53, %49, %46 : vector<2x4x256xi1>, vector<2x4x256xbf16>
    %c0_18 = arith.constant 0 : index
    %c20 = arith.constant 20 : index
    %c0_19 = arith.constant 0 : index
    %55 = vector.load %arg7[%c0_18, %c20, %c0_19] : memref<2x36x256xbf16, #tpu.memory_space<vmem>>, vector<2x4x256xbf16>
    tpu.vector_store %arg7[%c0_18, %c20, %c0_19], %54 {strides = array<i32>} : memref<2x36x256xbf16, #tpu.memory_space<vmem>>, vector<2x4x256xbf16>,
    %56 = vector.extract_strided_slice %1 {offsets = [0, 0, 16], sizes = [2, 4, 240], strides = [1, 1, 1]} : vector<2x4x256xbf16> to vector<2x4x240xbf16>
    %57 = vector.extract_strided_slice %1 {offsets = [0, 0, 0], sizes = [2, 4, 16], strides = [1, 1, 1]} : vector<2x4x256xbf16> to vector<2x4x16xbf16>
    %58 = tpu.concatenate %56, %57 in 2 : vector<2x4x240xbf16>, vector<2x4x16xbf16> -> vector<2x4x256xbf16>
    %59 = vector.extract_strided_slice %58 {offsets = [0, 0, 255], sizes = [2, 4, 1], strides = [1, 1, 1]} : vector<2x4x256xbf16> to vector<2x4x1xbf16>
    %60 = vector.extract_strided_slice %58 {offsets = [0, 0, 0], sizes = [2, 4, 255], strides = [1, 1, 1]} : vector<2x4x256xbf16> to vector<2x4x255xbf16>
    %61 = tpu.concatenate %59, %60 in 2 : vector<2x4x1xbf16>, vector<2x4x255xbf16> -> vector<2x4x256xbf16>
    %62 = vector.extract_strided_slice %58 {offsets = [0, 0, 15], sizes = [2, 4, 241], strides = [1, 1, 1]} : vector<2x4x256xbf16> to vector<2x4x241xbf16>
    %63 = vector.extract_strided_slice %58 {offsets = [0, 0, 0], sizes = [2, 4, 15], strides = [1, 1, 1]} : vector<2x4x256xbf16> to vector<2x4x15xbf16>
    %64 = tpu.concatenate %62, %63 in 2 : vector<2x4x241xbf16>, vector<2x4x15xbf16> -> vector<2x4x256xbf16>
    %c1_i32_20 = arith.constant 1 : i32
    %65 = vector.broadcast %c1_i32_20 : i32 to vector<1x1x256xi32>
    %66 = arith.cmpi slt, %2, %65 : vector<1x1x256xi32>
    %67 = vector.shape_cast %66 : vector<1x1x256xi1> to vector<1x1x256xi1>
    %68 = vector.broadcast %67 : vector<1x1x256xi1> to vector<2x4x256xi1>
    %69 = arith.select %68, %64, %61 : vector<2x4x256xi1>, vector<2x4x256xbf16>
    %c0_21 = arith.constant 0 : index
    %c24 = arith.constant 24 : index
    %c0_22 = arith.constant 0 : index
    %70 = vector.load %arg7[%c0_21, %c24, %c0_22] : memref<2x36x256xbf16, #tpu.memory_space<vmem>>, vector<2x4x256xbf16>
    tpu.vector_store %arg7[%c0_21, %c24, %c0_22], %69 {strides = array<i32>} : memref<2x36x256xbf16, #tpu.memory_space<vmem>>, vector<2x4x256xbf16>,
    %c0_23 = arith.constant 0 : index
    %c28 = arith.constant 28 : index
    %c0_24 = arith.constant 0 : index
    %71 = vector.load %arg7[%c0_23, %c28, %c0_24] : memref<2x36x256xbf16, #tpu.memory_space<vmem>>, vector<2x4x256xbf16>
    tpu.vector_store %arg7[%c0_23, %c28, %c0_24], %58 {strides = array<i32>} : memref<2x36x256xbf16, #tpu.memory_space<vmem>>, vector<2x4x256xbf16>,
    %72 = vector.extract_strided_slice %58 {offsets = [0, 0, 1], sizes = [2, 4, 255], strides = [1, 1, 1]} : vector<2x4x256xbf16> to vector<2x4x255xbf16>
    %73 = vector.extract_strided_slice %58 {offsets = [0, 0, 0], sizes = [2, 4, 1], strides = [1, 1, 1]} : vector<2x4x256xbf16> to vector<2x4x1xbf16>
    %74 = tpu.concatenate %72, %73 in 2 : vector<2x4x255xbf16>, vector<2x4x1xbf16> -> vector<2x4x256xbf16>
    %75 = vector.extract_strided_slice %58 {offsets = [0, 0, 241], sizes = [2, 4, 15], strides = [1, 1, 1]} : vector<2x4x256xbf16> to vector<2x4x15xbf16>
    %76 = vector.extract_strided_slice %58 {offsets = [0, 0, 0], sizes = [2, 4, 241], strides = [1, 1, 1]} : vector<2x4x256xbf16> to vector<2x4x241xbf16>
    %77 = tpu.concatenate %75, %76 in 2 : vector<2x4x15xbf16>, vector<2x4x241xbf16> -> vector<2x4x256xbf16>
    %c15_i32_25 = arith.constant 15 : i32
    %78 = vector.broadcast %c15_i32_25 : i32 to vector<1x1x256xi32>
    %79 = arith.cmpi sge, %2, %78 : vector<1x1x256xi32>
    %80 = vector.shape_cast %79 : vector<1x1x256xi1> to vector<1x1x256xi1>
    %81 = vector.broadcast %80 : vector<1x1x256xi1> to vector<2x4x256xi1>
    %82 = arith.select %81, %77, %74 : vector<2x4x256xi1>, vector<2x4x256xbf16>
    %c0_26 = arith.constant 0 : index
    %c32 = arith.constant 32 : index
    %c0_27 = arith.constant 0 : index
    %83 = vector.load %arg7[%c0_26, %c32, %c0_27] : memref<2x36x256xbf16, #tpu.memory_space<vmem>>, vector<2x4x256xbf16>
    tpu.vector_store %arg7[%c0_26, %c32, %c0_27], %82 {strides = array<i32>} : memref<2x36x256xbf16, #tpu.memory_space<vmem>>, vector<2x4x256xbf16>,
    %c0_28 = arith.constant 0 : index
    %c0_29 = arith.constant 0 : index
    %c0_30 = arith.constant 0 : index
    %84 = vector.load %arg3[%c0_28, %c0_29, %c0_30] : memref<1x32x1xf32, #tpu.memory_space<vmem>>, vector<1x32x1xf32>
    %85 = vector.shape_cast %84 : vector<1x32x1xf32> to vector<32x1xf32>
    %c0_31 = arith.constant 0 : index
    %c0_32 = arith.constant 0 : index
    %86 = vector.load %arg2[%c0_31, %c0_32] : memref<32x36xbf16, #tpu.memory_space<vmem>>, vector<32x36xbf16>
    %c0_33 = arith.constant 0 : index
    %c0_34 = arith.constant 0 : index
    %c0_35 = arith.constant 0 : index
    %87 = vector.load %arg7[%c0_33, %c0_34, %c0_35] : memref<2x36x256xbf16, #tpu.memory_space<vmem>>, vector<1x36x256xbf16>
    %88 = vector.shape_cast %87 : vector<1x36x256xbf16> to vector<36x256xbf16>
    %cst = arith.constant dense<0.000000e+00> : vector<32x256xf32>
    %89 = tpu.matmul %86, %88, %cst {dimension_numbers = #tpu.dot_dimension_numbers<[1], [0], [0], [1], [0, 0, 1, 1], [], []>} : vector<32x36xbf16>, vector<36x256xbf16>, vector<32x256xf32> -> vector<32x256xf32>
    %90 = vector.broadcast %85 : vector<32x1xf32> to vector<32x256xf32>
    %91 = arith.addf %89, %90 : vector<32x256xf32>
    %c0_36 = arith.constant 0 : index
    %c0_37 = arith.constant 0 : index
    %c0_38 = arith.constant 0 : index
    %92 = vector.load %arg8[%c0_36, %c0_37, %c0_38] : memref<2x32x256xf32, #tpu.memory_space<vmem>>, vector<1x32x256xf32>
    %93 = vector.shape_cast %92 : vector<1x32x256xf32> to vector<32x256xf32>
    %94 = vector.shape_cast %91 : vector<32x256xf32> to vector<1x32x256xf32>
    tpu.vector_store %arg8[%c0_36, %c0_37, %c0_38], %94 {strides = array<i32>} : memref<2x32x256xf32, #tpu.memory_space<vmem>>, vector<1x32x256xf32>,
    %c0_39 = arith.constant 0 : index
    %c0_40 = arith.constant 0 : index
    %95 = vector.load %arg2[%c0_39, %c0_40] : memref<32x36xbf16, #tpu.memory_space<vmem>>, vector<32x36xbf16>
    %c1 = arith.constant 1 : index
    %c0_41 = arith.constant 0 : index
    %c0_42 = arith.constant 0 : index
    %96 = vector.load %arg7[%c1, %c0_41, %c0_42] : memref<2x36x256xbf16, #tpu.memory_space<vmem>>, vector<1x36x256xbf16>
    %97 = vector.shape_cast %96 : vector<1x36x256xbf16> to vector<36x256xbf16>
    %cst_43 = arith.constant dense<0.000000e+00> : vector<32x256xf32>
    %98 = tpu.matmul %95, %97, %cst_43 {dimension_numbers = #tpu.dot_dimension_numbers<[1], [0], [0], [1], [0, 0, 1, 1], [], []>} : vector<32x36xbf16>, vector<36x256xbf16>, vector<32x256xf32> -> vector<32x256xf32>
    %99 = vector.broadcast %85 : vector<32x1xf32> to vector<32x256xf32>
    %100 = arith.addf %98, %99 : vector<32x256xf32>
    %c1_44 = arith.constant 1 : index
    %c0_45 = arith.constant 0 : index
    %c0_46 = arith.constant 0 : index
    %101 = vector.load %arg8[%c1_44, %c0_45, %c0_46] : memref<2x32x256xf32, #tpu.memory_space<vmem>>, vector<1x32x256xf32>
    %102 = vector.shape_cast %101 : vector<1x32x256xf32> to vector<32x256xf32>
    %103 = vector.shape_cast %100 : vector<32x256xf32> to vector<1x32x256xf32>
    tpu.vector_store %arg8[%c1_44, %c0_45, %c0_46], %103 {strides = array<i32>} : memref<2x32x256xf32, #tpu.memory_space<vmem>>, vector<1x32x256xf32>,
    %c0_47 = arith.constant 0 : index
    %c0_48 = arith.constant 0 : index
    %c0_49 = arith.constant 0 : index
    %104 = vector.load %arg8[%c0_47, %c0_48, %c0_49] : memref<2x32x256xf32, #tpu.memory_space<vmem>>, vector<2x32x256xf32>
    %cst_50 = arith.constant dense<0.000000e+00> : vector<2x32xf32>
    %105 = vector.multi_reduction <add>, %104, %cst_50 [2] : vector<2x32x256xf32> to vector<2x32xf32>
    %106 = vector.shape_cast %105 : vector<2x32xf32> to vector<2x32x1xf32>
    %cst_51 = arith.constant dense<0.000000e+00> : vector<32x1xf32>
    %107 = vector.multi_reduction <add>, %106, %cst_51 [0] : vector<2x32x1xf32> to vector<32x1xf32>
    %108 = vector.shape_cast %107 : vector<32x1xf32> to vector<1x32x1xf32>
    %109 = arith.mulf %104, %104 : vector<2x32x256xf32>
    %cst_52 = arith.constant dense<0.000000e+00> : vector<2x32xf32>
    %110 = vector.multi_reduction <add>, %109, %cst_52 [2] : vector<2x32x256xf32> to vector<2x32xf32>
    %111 = vector.shape_cast %110 : vector<2x32xf32> to vector<2x32x1xf32>
    %cst_53 = arith.constant dense<0.000000e+00> : vector<32x1xf32>
    %112 = vector.multi_reduction <add>, %111, %cst_53 [0] : vector<2x32x1xf32> to vector<32x1xf32>
    %113 = vector.shape_cast %112 : vector<32x1xf32> to vector<1x32x1xf32>
    %cst_54 = arith.constant 0.001953125 : f32
    %114 = vector.broadcast %cst_54 : f32 to vector<1x32x1xf32>
    %115 = arith.mulf %108, %114 : vector<1x32x1xf32>
    %cst_55 = arith.constant 0.001953125 : f32
    %116 = vector.broadcast %cst_55 : f32 to vector<1x32x1xf32>
    %117 = arith.mulf %113, %116 : vector<1x32x1xf32>
    %118 = arith.mulf %115, %115 : vector<1x32x1xf32>
    %119 = arith.subf %117, %118 : vector<1x32x1xf32>
    %cst_56 = arith.constant 0.000000e+00 : f32
    %120 = vector.broadcast %cst_56 : f32 to vector<1x32x1xf32>
    %121 = arith.maximumf %119, %120 : vector<1x32x1xf32>
    %c0_57 = arith.constant 0 : index
    %c0_58 = arith.constant 0 : index
    %c0_59 = arith.constant 0 : index
    %122 = vector.load %arg4[%c0_57, %c0_58, %c0_59] : memref<1x32x1xf32, #tpu.memory_space<vmem>>, vector<1x32x1xf32>
    %cst_60 = arith.constant 9.99999974E-6 : f32
    %123 = vector.broadcast %cst_60 : f32 to vector<1x32x1xf32>
    %124 = arith.addf %121, %123 : vector<1x32x1xf32>
    %125 = math.rsqrt %124 : vector<1x32x1xf32>
    %126 = arith.mulf %122, %125 : vector<1x32x1xf32>
    %c0_61 = arith.constant 0 : index
    %c0_62 = arith.constant 0 : index
    %c0_63 = arith.constant 0 : index
    %127 = vector.load %arg5[%c0_61, %c0_62, %c0_63] : memref<1x32x1xf32, #tpu.memory_space<vmem>>, vector<1x32x1xf32>
    %128 = arith.mulf %115, %126 : vector<1x32x1xf32>
    %129 = arith.subf %127, %128 : vector<1x32x1xf32>
    %130 = vector.broadcast %126 : vector<1x32x1xf32> to vector<2x32x256xf32>
    %131 = arith.mulf %104, %130 : vector<2x32x256xf32>
    %132 = vector.broadcast %129 : vector<1x32x1xf32> to vector<2x32x256xf32>
    %133 = arith.addf %131, %132 : vector<2x32x256xf32>
    %c0_64 = arith.constant 0 : index
    %c0_65 = arith.constant 0 : index
    %c0_66 = arith.constant 0 : index
    %134 = vector.load %arg6[%c0_64, %c0_65, %c0_66] : memref<2x32x256xf32, #tpu.memory_space<vmem>>, vector<2x32x256xf32>
    tpu.vector_store %arg6[%c0_64, %c0_65, %c0_66], %133 {strides = array<i32>} : memref<2x32x256xf32, #tpu.memory_space<vmem>>, vector<2x32x256xf32>,
    return
  }
}

</mosaic_0001>

<bundles_post_ra>
// kernel: tpu_custom_call.1
= control target key start
LH: loop header
LB: loop body
LE: loop exit
PB: predicated region body
PF: predicated region fallthrough
CT: control target
= control target key end

     0   :  { %s1135_s25 = smov 16   ;;  %s1588_s0 = inlined_call_operand.vmem [shape: f32[2,4,256], index: 0, kind: input, shape index: {}]   ;;  %s1589_s1 = inlined_call_operand.vmem [shape: s32[1,1,256], index: 1, kind: input, shape index: {}]   ;;  %s1590_s2 = inlined_call_operand.vmem [shape: bf16[32,36], index: 2, kind: input, shape index: {}]   ;;  %s1591_s3 = inlined_call_operand.vmem [shape: f32[1,32,1], index: 3, kind: input, shape index: {}]   ;;  %s1592_s4 = inlined_call_operand.vmem [shape: f32[1,32,1], index: 4, kind: input, shape index: {}]   ;;  %s1593_s5 = inlined_call_operand.vmem [shape: f32[1,32,1], index: 5, kind: input, shape index: {}]   ;;  %s1594_s6 = inlined_call_operand.hbm [shape: f32[2,32,256], index: 6, kind: output, shape index: {}]  }
   0x1   :  { %v27_v0 = vld [vmem:[%s1588_s0] sm:$0xff]  ;;  %v28_v1 = vld [vmem:[%s1588_s0 + $0x8] sm:$0xff] }
   0x2   :  { %v35_v2 = vpack.c.bf16 %v27_v0, %v27_v0  ;;  %v31_v3 = vcombine.high %v27_v0, %v27_v0  ;;  %v32_v4 = vcombine.high %v28_v1, %v28_v1  ;;  %v37_v7 = vpack.c.bf16 %v28_v1, %v28_v1 }
   0x4   :  { %48 = vrot.lane.b32.xlu1 %v35_v2, %s1135_s25  ;;  %v36_v5 = vpack.c.bf16 %v31_v3, %v31_v3  ;;  %v1068_v6 = vpack.c.bf16 %v31_v3, %v27_v0  ;;  %v1069_v8 = vpack.c.bf16 %v32_v4, %v28_v1 }
   0x5   :  { %11 = vsyncpa [#allocation5], 0  ;;  %v38_v9 = vpack.c.bf16 %v32_v4, %v32_v4  ;;  %s1136_s0 = smov 112   ;;  %s1137_s26 = smov 1   ;;  %v1141_v10 = vmov 0   ;;  %v110_v11 = vlaneseq  ;;  %vm52_vm0 = vcmask 130048  }
   0x6   :  { %316 = vst [vmem:[#allocation2 + $0x10] sm:$0x33] %v1068_v6  ;;  %42 = vrot.lane.b32.xlu0 %v36_v5, %s1135_s25  ;;  %317 = vst [vmem:[#allocation2 + $0x38] sm:$0x33] %v1069_v8  ;;  %s1138_s27 = smov 113   ;;  %s1139_s28 = smov 127   ;;  %640 = vmatprep.mubr.bf16.mxu0 %v1141_v10 }
   0x7   :  { %s1140_s29 = smov 15   ;;  %758 = vmatprep.mubr.bf16.mxu1 %v1141_v10  ;;  %1079 = vset.pattern.permute.xlu0 %v1141_v10  ;;  %v39_v12 = vld [vmem:[%s1589_s1] sm:$0x3]  ;;  %v1212_v14 = vshrl.u32 %v110_v11, 7  ;;  %vm386_vm2 = vcmask 916480   ;;  %vm72_vm7 = vcmask 7168  }
   0x8   :  { %50 = vrot.lane.b32.xlu1 %v37_v7, %s1135_s25  ;;  %vm108_vm1 = vcmp.lt.s32.totalorder %v39_v12, 1  ;;  %vm206_vm6 = vcmp.ge.s32.totalorder %v39_v12, 15  ;;  %vm94_vm8 = vcmask 924672   ;;  %vm170_vm14 = vcmask 1039360  }
   0x9   :  { %1080 = vset.pattern.permute.xlu1 %v1141_v10  ;;  %v1223_v20 = vsub.s32 0, %v1212_v14  ;;  %v116_v21 = vsub.s32 1, %v1212_v14  ;;  %v109_v22 = vsel %vm108_vm1, 1, %v1141_v10  ;;  %v128_v43 = vsub.s32 4, %v1212_v14 }
   0xa   :  { %44 = vrot.lane.b32.xlu0 %v38_v9, %s1135_s25  ;;  %v207_v51 = vsel %vm206_vm6, 1, %v1141_v10  ;;  %vm192_vm15 = vcmask 121856  }
   0xb   :  { %v113_v29 = vrot.slane %v109_v22, %v1223_v20  ;;  %v117_v30 = vrot.slane %v109_v22, %v116_v21  ;;  %v211_v57 = vrot.slane %v207_v51, %v1223_v20  ;;  %v215_v60 = vrot.slane %v207_v51, %v116_v21 }
   0xc   :  { %380 = vrot.lane.b32.xlu1 %v36_v5, %s1136_s0 }
   0xd   :  { %vm118_vm3 = vcmp.eq.s32.totalorder %v113_v29, 1  ;;  %vm119_vm4 = vcmp.eq.s32.totalorder %v117_v30, 1  ;;  %vm216_vm11 = vcmp.eq.s32.totalorder %v211_v57, 1  ;;  %vm217_vm12 = vcmp.eq.s32.totalorder %v215_v60, 1 }
   0xe   :  { %378 = vrot.lane.b32.xlu0 %v35_v2, %s1136_s0  ;;  %vm120_vm5 = vmpackc.low %vm119_vm4, %vm118_vm3  ;;  %vm594_vm3 = vcmask 293888  }
   0xf   :  { %v121_v46 = vsel %vm120_vm5, 65537, %v1141_v10  ;;  %vm218_vm13 = vmpackc.low %vm217_vm12, %vm216_vm11 }
  0x10   :  { %384 = vrot.lane.b32.xlu1 %v38_v9, %s1136_s0  ;;  %v125_v48 = vrot.slane %v121_v46, %v1223_v20  ;;  %v1269_v49 = vrot.slane %v121_v46, %v128_v43 }
  0x12   :  { %382 = vrot.lane.b32.xlu0 %v37_v7, %s1136_s0  ;;  %vm1278_vm9 = vcmp.ne.s16.totalorder %v125_v48, 0  ;;  %vm131_vm10 = vcmp.ne.s16.totalorder %v1269_v49, 0 }
  0x14   :  { %250 = vrot.lane.b32.xlu1 %v38_v9, %s1137_s26 }
  0x16   :  { %248 = vrot.lane.b32.xlu0 %v36_v5, %s1137_s26 }
  0x18   :  { %254 = vrot.lane.b32.xlu1 %v37_v7, %s1137_s26 }
  0x1a   :  { %252 = vrot.lane.b32.xlu0 %v35_v2, %s1137_s26 }
  0x1c   :  { %270 = vrot.lane.b32.xlu1 %v36_v5, %s1138_s27 }
  0x1e   :  { %268 = vrot.lane.b32.xlu0 %v35_v2, %s1138_s27 }
  0x20   :  { %274 = vrot.lane.b32.xlu1 %v38_v9, %s1138_s27 }
  0x22   :  { %272 = vrot.lane.b32.xlu0 %v37_v7, %s1138_s27 }
  0x24   :  { %320 = vrot.lane.b32.xlu1 %v36_v5, %s1139_s28 }
  0x26   :  { %318 = vrot.lane.b32.xlu0 %v35_v2, %s1139_s28 }
  0x28   :  { %324 = vrot.lane.b32.xlu1 %v38_v9, %s1139_s28 }
  0x2a   :  { %322 = vrot.lane.b32.xlu0 %v37_v7, %s1139_s28 }
  0x2c   :  { %340 = vrot.lane.b32.xlu1 %v38_v9, %s1140_s29 }
  0x2e   :  { %338 = vrot.lane.b32.xlu0 %v36_v5, %s1140_s29 }
  0x30   :  { %344 = vrot.lane.b32.xlu1 %v37_v7, %s1140_s29 }
  0x32   :  { %342 = vrot.lane.b32.xlu0 %v35_v2, %s1140_s29 }
  0x76   :  { %v49_v13 = vpop.permute.xlu1 %48 }
  0x78   :  { %v43_v15 = vpop.permute.xlu0 %42 }
  0x79   :  { %v1214_v16 = vsel %vm52_vm0, %v49_v13, %v43_v15  ;;  %v1216_v17 = vsel %vm52_vm0, %v43_v15, %v49_v13  ;;  %v219_v15 = vsel %vm218_vm13, 65537, %v1141_v10 }
  0x7a   :  { %v1030_v18 = vcombine.low %v1216_v17, %v1214_v16  ;;  %62 = vrot.lane.b32.xlu0 %v1214_v16, %s1137_s26  ;;  %v51_v19 = vpop.permute.xlu1 %50 }
  0x7c   :  { %v156_v23 = vrot.slane %v1030_v18, 6  ;;  %v45_v24 = vpop.permute.xlu0 %44  ;;  %v223_v18 = vrot.slane %v219_v15, %v1223_v20 }
  0x7d   :  { %v1227_v25 = vsel %vm52_vm0, %v51_v19, %v45_v24  ;;  %v1229_v26 = vsel %vm52_vm0, %v45_v24, %v51_v19  ;;  %v1316_v19 = vrot.slane %v219_v15, %v128_v43 }
  0x7e   :  { %160 = vst [vmem:[#allocation2] sm:$0xcc] %v156_v23  ;;  %v1031_v27 = vcombine.low %v1229_v26, %v1227_v25  ;;  %68 = vrot.lane.b32.xlu0 %v1216_v17, %s1137_s26  ;;  %64 = vrot.lane.b32.xlu1 %v1227_v25, %s1137_s26  ;;  %v381_v28 = vpop.permute.xlu1 %380  ;;  %vm1324_vm0 = vcmp.ne.s16.totalorder %v223_v18, 0 }
  0x7f   :  { %vm229_vm1 = vcmp.ne.s16.totalorder %v1316_v19, 0 }
  0x80   :  { %v157_v31 = vrot.slane %v1031_v27, 6  ;;  %v379_v32 = vpop.permute.xlu0 %378 }
  0x81   :  { %v1239_v33 = vsel %vm386_vm2, %v379_v32, %v381_v28  ;;  %v1242_v34 = vsel %vm386_vm2, %v381_v28, %v379_v32 }
  0x82   :  { %161 = vst [vmem:[#allocation2 + $0x28] sm:$0xcc] %v157_v31  ;;  %86 = vrot.lane.b32.xlu0 %v1216_v17, %s1138_s27  ;;  %70 = vrot.lane.b32.xlu1 %v1229_v26, %s1137_s26  ;;  %v1042_v35 = vcombine.low %v1239_v33, %v1242_v34  ;;  %v385_v36 = vpop.permute.xlu1 %384 }
  0x84   :  { %v462_v37 = vrot.slane %v1042_v35, 6  ;;  %v383_v38 = vpop.permute.xlu0 %382 }
  0x85   :  { %v1251_v39 = vsel %vm386_vm2, %v383_v38, %v385_v36  ;;  %v1254_v40 = vsel %vm386_vm2, %v385_v36, %v383_v38  ;;  %vm601_vm2 = vcmask 1041408  }
  0x86   :  { %90 = vrot.lane.b32.xlu0 %v1229_v26, %s1138_s27  ;;  %88 = vrot.lane.b32.xlu1 %v1214_v16, %s1138_s27  ;;  %466 = vst [vmem:[#allocation2 + $0x18] sm:$0xcc] %v462_v37  ;;  %v1043_v41 = vcombine.low %v1251_v39, %v1254_v40  ;;  %v251_v42 = vpop.permute.xlu1 %250 }
  0x88   :  { %v463_v44 = vrot.slane %v1043_v41, 6  ;;  %v249_v45 = vpop.permute.xlu0 %248 }
  0x8a   :  { %162 = vrot.lane.b32.xlu0 %v1216_v17, %s1139_s28  ;;  %92 = vrot.lane.b32.xlu1 %v1227_v25, %s1138_s27  ;;  %467 = vst [vmem:[#allocation2 + $0x40] sm:$0xcc] %v463_v44  ;;  %v255_v47 = vpop.permute.xlu1 %254  ;;  %v526_v44 = vld [vmem:[%s1591_s3] sm:$0xff] }
  0x8b   :  { %v257_v0 = vsel %vm72_vm7, %v255_v47, %v251_v42  ;;  %v266_v1 = vsel %vm72_vm7, %v251_v42, %v255_v47 }
  0x8c   :  { %v253_v50 = vpop.permute.xlu0 %252 }
  0x8d   :  { %v256_v53 = vsel %vm72_vm7, %v253_v50, %v249_v45  ;;  %v262_v54 = vsel %vm72_vm7, %v249_v45, %v253_v50 }
  0x8e   :  { %166 = vrot.lane.b32.xlu0 %v1229_v26, %s1139_s28  ;;  %164 = vrot.lane.b32.xlu1 %v1214_v16, %s1139_s28  ;;  %v271_v52 = vpop.permute.xlu1 %270 }
  0x90   :  { %v269_v56 = vpop.permute.xlu0 %268 }
  0x91   :  { %v276_v58 = vsel %vm94_vm8, %v269_v56, %v271_v52  ;;  %v282_v59 = vsel %vm94_vm8, %v271_v52, %v269_v56 }
  0x92   :  { %184 = vrot.lane.b32.xlu0 %v1214_v16, %s1140_s29  ;;  %168 = vrot.lane.b32.xlu1 %v1227_v25, %s1139_s28  ;;  %v288_v61 = vsel %vm1278_vm9, %v276_v58, %v262_v54  ;;  %v289_v62 = vsel %vm131_vm10, %v282_v59, %v256_v53  ;;  %v275_v63 = vpop.permute.xlu1 %274 }
  0x93   :  { %v1034_v2 = vcombine.low %v288_v61, %v289_v62 }
  0x94   :  { %v273_v3 = vpop.permute.xlu0 %272 }
  0x95   :  { %v302_v4 = vrot.slane %v1034_v2, 6  ;;  %v277_v5 = vsel %vm94_vm8, %v273_v3, %v275_v63  ;;  %v286_v6 = vsel %vm94_vm8, %v275_v63, %v273_v3 }
  0x96   :  { %188 = vrot.lane.b32.xlu0 %v1216_v17, %s1140_s29  ;;  %186 = vrot.lane.b32.xlu1 %v1227_v25, %s1140_s29  ;;  %v290_v7 = vsel %vm1278_vm9, %v277_v5, %v266_v1  ;;  %v291_v8 = vsel %vm131_vm10, %v286_v6, %v257_v0  ;;  %v321_v9 = vpop.permute.xlu1 %320 }
  0x97   :  { %306 = vst [vmem:[#allocation2 + $0x8] sm:$0xcc] %v302_v4  ;;  %v1035_v11 = vcombine.low %v290_v7, %v291_v8 }
  0x98   :  { %v319_v12 = vpop.permute.xlu0 %318 }
  0x99   :  { %v303_v13 = vrot.slane %v1035_v11, 6  ;;  %v326_v25 = vsel %vm170_vm14, %v319_v12, %v321_v9 }
  0x9a   :  { %190 = vrot.lane.b32.xlu1 %v1229_v26, %s1140_s29  ;;  %398 = vrot.lane.b32.xlu0 %v1242_v34, %s1137_s26  ;;  %v325_v14 = vpop.permute.xlu1 %324  ;;  %v332_v26 = vsel %vm170_vm14, %v321_v9, %v319_v12 }
  0x9b   :  { %307 = vst [vmem:[#allocation2 + $0x30] sm:$0xcc] %v303_v13 }
  0x9c   :  { %v323_v16 = vpop.permute.xlu0 %322 }
  0x9d   :  { %v327_v22 = vsel %vm170_vm14, %v323_v16, %v325_v14  ;;  %v336_v23 = vsel %vm170_vm14, %v325_v14, %v323_v16 }
  0x9e   :  { %402 = vrot.lane.b32.xlu0 %v1239_v33, %s1137_s26  ;;  %400 = vrot.lane.b32.xlu1 %v1254_v40, %s1137_s26  ;;  %v341_v17 = vpop.permute.xlu1 %340 }
  0xa0   :  { %v339_v21 = vpop.permute.xlu0 %338 }
  0xa2   :  { %418 = vrot.lane.b32.xlu0 %v1239_v33, %s1138_s27  ;;  %404 = vrot.lane.b32.xlu1 %v1251_v39, %s1137_s26  ;;  %v345_v20 = vpop.permute.xlu1 %344 }
  0xa3   :  { %v347_v27 = vsel %vm192_vm15, %v345_v20, %v341_v17  ;;  %v356_v28 = vsel %vm192_vm15, %v341_v17, %v345_v20 }
  0xa4   :  { %v343_v29 = vpop.permute.xlu0 %342  ;;  %v360_v30 = vsel %vm1324_vm0, %v356_v28, %v327_v22  ;;  %v361_v31 = vsel %vm229_vm1, %v347_v27, %v336_v23 }
  0xa5   :  { %v346_v32 = vsel %vm192_vm15, %v343_v29, %v339_v21  ;;  %v352_v35 = vsel %vm192_vm15, %v339_v21, %v343_v29  ;;  %v1039_v36 = vcombine.low %v360_v30, %v361_v31 }
  0xa6   :  { %422 = vrot.lane.b32.xlu0 %v1251_v39, %s1138_s27  ;;  %420 = vrot.lane.b32.xlu1 %v1242_v34, %s1138_s27  ;;  %v358_v37 = vsel %vm1324_vm0, %v352_v35, %v326_v25  ;;  %v359_v38 = vsel %vm229_vm1, %v346_v32, %v332_v26 }
  0xa7   :  { %v1038_v41 = vcombine.low %v358_v37, %v359_v38  ;;  %v373_v42 = vrot.slane %v1039_v36, 6 }
  0xa9   :  { %v372_v43 = vrot.slane %v1038_v41, 6  ;;  %377 = vst [vmem:[#allocation2 + $0x38] sm:$0xcc] %v373_v42 }
  0xaa   :  { %468 = vrot.lane.b32.xlu0 %v1239_v33, %s1139_s28  ;;  %424 = vrot.lane.b32.xlu1 %v1254_v40, %s1138_s27 }
  0xab   :  { %376 = vst [vmem:[#allocation2 + $0x10] sm:$0xcc] %v372_v43 }
  0xae   :  { %472 = vrot.lane.b32.xlu0 %v1251_v39, %s1139_s28  ;;  %470 = vrot.lane.b32.xlu1 %v1242_v34, %s1139_s28 }
  0xb2   :  { %488 = vrot.lane.b32.xlu0 %v1242_v34, %s1140_s29  ;;  %474 = vrot.lane.b32.xlu1 %v1254_v40, %s1139_s28  ;;  %v527_v34 = vld [vmem:[%s1591_s3 + $0x8] sm:$0xff] }
  0xb6   :  { %492 = vrot.lane.b32.xlu0 %v1239_v33, %s1140_s29  ;;  %490 = vrot.lane.b32.xlu1 %v1254_v40, %s1140_s29  ;;  %v529_v33 = vld [vmem:[%s1591_s3 + $0x18] sm:$0xff]  ;;  %v528_v40 = vld [vmem:[%s1591_s3 + $0x10] sm:$0xff] }
  0xba   :  { %494 = vrot.lane.b32.xlu1 %v1251_v39, %s1140_s29  ;;  %541 = vperm.xlu0 %1079, %v526_v44  }
  0xbe   :  { %546 = vperm.xlu1 %1080, %v527_v34   ;;  %556 = vperm.xlu0 %1079, %v529_v33  }
  0xc2   :  { %551 = vperm.xlu1 %1080, %v528_v40  }
  0xec   :  { %v63_v39 = vpop.permute.xlu0 %62 }
  0xf0   :  { %v65_v45 = vpop.permute.xlu1 %64  ;;  %v69_v46 = vpop.permute.xlu0 %68 }
  0xf1   :  { %v73_v52 = vsel %vm72_vm7, %v69_v46, %v63_v39  ;;  %v80_v53 = vsel %vm72_vm7, %v63_v39, %v69_v46 }
  0xf4   :  { %v71_v47 = vpop.permute.xlu1 %70  ;;  %v87_v48 = vpop.permute.xlu0 %86 }
  0xf5   :  { %v74_v62 = vsel %vm72_vm7, %v71_v47, %v65_v45  ;;  %v84_v63 = vsel %vm72_vm7, %v65_v45, %v71_v47 }
  0xf8   :  { %v89_v50 = vpop.permute.xlu1 %88  ;;  %v91_v51 = vpop.permute.xlu0 %90 }
  0xf9   :  { %v95_v54 = vsel %vm94_vm8, %v87_v48, %v89_v50  ;;  %v102_v56 = vsel %vm94_vm8, %v89_v50, %v87_v48 }
  0xfa   :  { %v132_v57 = vsel %vm1278_vm9, %v95_v54, %v80_v53  ;;  %v133_v58 = vsel %vm131_vm10, %v102_v56, %v73_v52 }
  0xfb   :  { %v1028_v59 = vcombine.low %v132_v57, %v133_v58 }
  0xfc   :  { %v93_v60 = vpop.permute.xlu1 %92  ;;  %v163_v61 = vpop.permute.xlu0 %162 }
  0xfd   :  { %148 = vst [vmem:[#allocation2] sm:$0x33] %v1028_v59  ;;  %v96_v0 = vsel %vm94_vm8, %v91_v51, %v93_v60  ;;  %v106_v1 = vsel %vm94_vm8, %v93_v60, %v91_v51 }
  0xfe   :  { %v134_v2 = vsel %vm1278_vm9, %v96_v0, %v84_v63  ;;  %v135_v3 = vsel %vm131_vm10, %v106_v1, %v74_v62 }
  0xff   :  { %v1029_v4 = vcombine.low %v134_v2, %v135_v3 }
 0x100   :  { %v165_v5 = vpop.permute.xlu1 %164  ;;  %v167_v6 = vpop.permute.xlu0 %166 }
 0x101   :  { %149 = vst [vmem:[#allocation2 + $0x28] sm:$0x33] %v1029_v4  ;;  %v171_v12 = vsel %vm170_vm14, %v163_v61, %v165_v5  ;;  %v178_v13 = vsel %vm170_vm14, %v165_v5, %v163_v61 }
 0x104   :  { %v169_v7 = vpop.permute.xlu1 %168  ;;  %v185_v8 = vpop.permute.xlu0 %184 }
 0x105   :  { %v172_v23 = vsel %vm170_vm14, %v167_v6, %v169_v7  ;;  %v182_v20 = vsel %vm170_vm14, %v169_v7, %v167_v6 }
 0x108   :  { %v187_v9 = vpop.permute.xlu1 %186  ;;  %v189_v11 = vpop.permute.xlu0 %188 }
 0x109   :  { %v193_v14 = vsel %vm192_vm15, %v189_v11, %v185_v8  ;;  %v200_v15 = vsel %vm192_vm15, %v185_v8, %v189_v11 }
 0x10a   :  { %v230_v16 = vsel %vm1324_vm0, %v200_v15, %v171_v12  ;;  %v231_v17 = vsel %vm229_vm1, %v193_v14, %v178_v13 }
 0x10b   :  { %v1032_v18 = vcombine.low %v230_v16, %v231_v17 }
 0x10c   :  { %v191_v21 = vpop.permute.xlu1 %190  ;;  %v399_v22 = vpop.permute.xlu0 %398 }
 0x10d   :  { %246 = vst [vmem:[#allocation2 + $0x8] sm:$0x33] %v1032_v18  ;;  %v194_v25 = vsel %vm192_vm15, %v191_v21, %v187_v9  ;;  %v204_v26 = vsel %vm192_vm15, %v187_v9, %v191_v21 }
 0x10e   :  { %v232_v27 = vsel %vm1324_vm0, %v204_v26, %v172_v23  ;;  %v233_v28 = vsel %vm229_vm1, %v194_v25, %v182_v20  ;;  %v1097_v20 = vld [vmem:[%s1590_s2] sm:$0xff]  }
 0x10f   :  { %v1033_v29 = vcombine.low %v232_v27, %v233_v28  ;;  %v1100_v27 = vld [vmem:[%s1590_s2] sm:$0xff]   ;;  %v1101_v28 = vld [vmem:[%s1590_s2 + $0x8] sm:$0xff]  }
 0x110   :  { %v401_v30 = vpop.permute.xlu1 %400  ;;  %v403_v31 = vpop.permute.xlu0 %402 }
 0x111   :  { %247 = vst [vmem:[#allocation2 + $0x30] sm:$0x33] %v1033_v29  ;;  %v406_v44 = vsel %vm72_vm7, %v403_v31, %v399_v22  ;;  %v412_v34 = vsel %vm72_vm7, %v399_v22, %v403_v31  ;;  %v1102_v29 = vld [vmem:[%s1590_s2 + $0x8] sm:$0xff]  }
 0x114   :  { %v405_v32 = vpop.permute.xlu1 %404  ;;  %v419_v35 = vpop.permute.xlu0 %418  ;;  %v1083_v36 = vld [vmem:[#allocation2 + $0x4] ss:$8 sps:$4 sm:$0xff]   ;;  %v1085_v37 = vld [vmem:[#allocation2] ss:$8 sps:$4 sm:$0xff]  }
 0x115   :  { %608 = vmatprep.subr.bf16.mxu0 %v1083_v36  ;;  %v407_v50 = vsel %vm72_vm7, %v405_v32, %v401_v30  ;;  %v416_v51 = vsel %vm72_vm7, %v401_v30, %v405_v32 }
 0x116   :  { %609 = vmatpush1.bf16.msra.mxu0 %v1085_v37 }
 0x118   :  { %v421_v38 = vpop.permute.xlu1 %420  ;;  %v423_v41 = vpop.permute.xlu0 %422  ;;  %v1086_v42 = vld [vmem:[#allocation2 + $0x2c] ss:$8 sps:$4 sm:$0xff]   ;;  %v1088_v43 = vld [vmem:[#allocation2 + $0x28] ss:$8 sps:$4 sm:$0xff]  }
 0x119   :  { %v426_v33 = vsel %vm94_vm8, %v419_v35, %v421_v38  ;;  %v432_v40 = vsel %vm94_vm8, %v421_v38, %v419_v35  ;;  %726 = vmatprep.subr.bf16.mxu1 %v1086_v42 }
 0x11a   :  { %v438_v39 = vsel %vm1278_vm9, %v426_v33, %v412_v34  ;;  %v439_v45 = vsel %vm131_vm10, %v432_v40, %v406_v44  ;;  %727 = vmatpush1.bf16.msra.mxu1 %v1088_v43 }
 0x11b   :  { %v1040_v46 = vcombine.low %v438_v39, %v439_v45 }
 0x11c   :  { %v425_v47 = vpop.permute.xlu1 %424  ;;  %v469_v48 = vpop.permute.xlu0 %468 }
 0x11d   :  { %454 = vst [vmem:[#allocation2 + $0x18] sm:$0x33] %v1040_v46  ;;  %v427_v52 = vsel %vm94_vm8, %v423_v41, %v425_v47  ;;  %v436_v53 = vsel %vm94_vm8, %v425_v47, %v423_v41 }
 0x11e   :  { %v440_v54 = vsel %vm1278_vm9, %v427_v52, %v416_v51  ;;  %v441_v56 = vsel %vm131_vm10, %v436_v53, %v407_v50 }
 0x11f   :  { %v1041_v57 = vcombine.low %v440_v54, %v441_v56 }
 0x120   :  { %v471_v58 = vpop.permute.xlu1 %470  ;;  %v473_v59 = vpop.permute.xlu0 %472 }
 0x121   :  { %455 = vst [vmem:[#allocation2 + $0x40] sm:$0x33] %v1041_v57  ;;  %v476_v55 = vsel %vm170_vm14, %v469_v48, %v471_v58  ;;  %v482_v4 = vsel %vm170_vm14, %v471_v58, %v469_v48 }
 0x124   :  { %v475_v60 = vpop.permute.xlu1 %474  ;;  %v489_v61 = vpop.permute.xlu0 %488  ;;  %v1089_v62 = vld [vmem:[#allocation2 + $0x14] ss:$8 sps:$4 sm:$0xff]   ;;  %v1091_v63 = vld [vmem:[#allocation2 + $0x10] ss:$8 sps:$4 sm:$0xff]  }
 0x125   :  { %610 = vmatprep.subr.bf16.mxu0 %v1089_v62  ;;  %v477_v11 = vsel %vm170_vm14, %v473_v59, %v475_v60  ;;  %v486_v12 = vsel %vm170_vm14, %v475_v60, %v473_v59 }
 0x126   :  { %611 = vmatpush1.bf16.msra.mxu0 %v1091_v63 }
 0x128   :  { %v491_v0 = vpop.permute.xlu1 %490  ;;  %v493_v1 = vpop.permute.xlu0 %492  ;;  %v1092_v2 = vld [vmem:[#allocation2 + $0x3c] ss:$8 sps:$4 sm:$0xff]   ;;  %v1094_v3 = vld [vmem:[#allocation2 + $0x38] ss:$8 sps:$4 sm:$0xff]  }
 0x129   :  { %v496_v49 = vsel %vm192_vm15, %v493_v1, %v489_v61  ;;  %v502_v5 = vsel %vm192_vm15, %v489_v61, %v493_v1  ;;  %728 = vmatprep.subr.bf16.mxu1 %v1092_v2 }
 0x12a   :  { %v508_v6 = vsel %vm1324_vm0, %v502_v5, %v476_v55  ;;  %v509_v7 = vsel %vm229_vm1, %v496_v49, %v482_v4  ;;  %729 = vmatpush1.bf16.msra.mxu1 %v1094_v3 }
 0x12b   :  { %v1044_v8 = vcombine.low %v508_v6, %v509_v7 }
 0x12c   :  { %v495_v9 = vpop.permute.xlu1 %494 }
 0x12d   :  { %524 = vst [vmem:[#allocation2 + $0x20] sm:$0x33] %v1044_v8  ;;  %v497_v13 = vsel %vm192_vm15, %v495_v9, %v491_v0  ;;  %v506_v14 = vsel %vm192_vm15, %v491_v0, %v495_v9 }
 0x12e   :  { %v510_v15 = vsel %vm1324_vm0, %v506_v14, %v477_v11  ;;  %v511_v16 = vsel %vm229_vm1, %v497_v13, %v486_v12 }
 0x12f   :  { %v1045_v17 = vcombine.low %v510_v15, %v511_v16 }
 0x131   :  { %525 = vst [vmem:[#allocation2 + $0x48] sm:$0x33] %v1045_v17 }
 0x134   :  { %v538_v18 = vld [vmem:[#allocation2 + $0x20] sm:$0x33] }
 0x135   :  { %v1053_v21 = vcombine.high %v538_v18, %v538_v18  ;;  %v1052_v22 = vcombine.low %v538_v18, %v538_v18 }
 0x137   :  { %1054 = vmatprep.subr.msk.bf16.mxu0 %vm601_vm2, %v1053_v21  ;;  %v603_v23 = vsel %vm601_vm2, %v1052_v22, 0 }
 0x138   :  { %613 = vmatpush1.bf16.msra.mxu0 %v603_v23  ;;  %v678_v25 = vld [vmem:[#allocation2 + $0x48] sm:$0x33] }
 0x139   :  { %v1064_v24 = vcombine.high %v678_v25, %v678_v25  ;;  %v1063_v26 = vcombine.low %v678_v25, %v678_v25  ;;  %v542_v31 = vpop.permute.xlu0 %541 }
 0x13b   :  { %1055 = vmatmul.mubr.msk.bf16.vlgmr.msra.gmra.mrb[0].mxu0 %vm594_vm3, %v1097_v20  ;;  %1065 = vmatprep.subr.msk.bf16.mxu1 %vm601_vm2, %v1064_v24  ;;  %v721_v19 = vsel %vm601_vm2, %v1063_v26, 0 }
 0x13c   :  { %731 = vmatpush1.bf16.msra.mxu1 %v721_v19  ;;  %650 = vmatprep.mubr.bf16.mxu0 %v1141_v10 }
 0x13d   :  { %v547_v38 = vpop.permute.xlu1 %546  ;;  %v557_v5 = vpop.permute.xlu0 %556 }
 0x13f   :  { %1066 = vmatmul.mubr.msk.bf16.vlgmr.msra.gmra.mrb[0].mxu1 %vm594_vm3, %v1100_v27 }
 0x140   :  { %768 = vmatprep.mubr.bf16.mxu1 %v1141_v10 }
 0x141   :  { %v552_v6 = vpop.permute.xlu1 %551 }
 0x143   :  { %1056 = vmatmul.mubr.msk.bf16.gmra.mrb[4].mxu0 %vm594_vm3, %v1101_v28 }
 0x147   :  { %1067 = vmatmul.mubr.msk.bf16.gmra.mrb[4].mxu1 %vm594_vm3, %v1102_v29 }
 0x20e   :  { %v642_v30 = vpop.f32.mrb[0].mxu0 }
 0x20f   :  { %v1455_v32 = vadd.f32 %v642_v30, %v542_v31  ;;  %v644_v35 = vpop.f32.mrb[1].mxu0 }
 0x210   :  { %v1457_v36 = vadd.f32 %v644_v35, %v542_v31  ;;  %v646_v37 = vpop.f32.mrb[2].mxu0 }
 0x211   :  { %v648_v41 = vpop.f32.mrb[3].mxu0  ;;  %v1463_v34 = vadd.f32 %v646_v37, %v547_v38  ;;  %v832_v60 = vmul.f32 %v1455_v32, %v1455_v32 }
 0x212   :  { %v760_v42 = vpop.f32.mrb[0].mxu1  ;;  %v804_v10 = vadd.f32 %v1457_v36, %v1455_v32  ;;  %v1465_v33 = vadd.f32 %v648_v41, %v547_v38  ;;  %v833_v61 = vmul.f32 %v1457_v36, %v1457_v36 }
 0x213   :  { %v1461_v43 = vadd.f32 %v760_v42, %v542_v31  ;;  %v762_v44 = vpop.f32.mrb[1].mxu1  ;;  %v834_v54 = vmul.f32 %v1463_v34, %v1463_v34 }
 0x214   :  { %v1467_v40 = vadd.f32 %v762_v44, %v542_v31  ;;  %v764_v39 = vpop.f32.mrb[2].mxu1  ;;  %805 = vadd.xlane.f32.xlu1 %v804_v10  ;;  %v835_v56 = vmul.f32 %v1465_v33, %v1465_v33  ;;  %v807_v59 = vadd.f32 %v1465_v33, %v1463_v34  ;;  %v848_v55 = vadd.f32 %v833_v61, %v832_v60 }
 0x215   :  { %v1469_v45 = vadd.f32 %v764_v39, %v547_v38  ;;  %v766_v46 = vpop.f32.mrb[3].mxu1  ;;  %v840_v4 = vmul.f32 %v1461_v43, %v1461_v43 }
 0x216   :  { %v1471_v47 = vadd.f32 %v766_v46, %v547_v38  ;;  %v652_v48 = vpop.f32.mrb[4].mxu0  ;;  %v816_v50 = vadd.f32 %v1467_v40, %v1461_v43  ;;  %v851_v0 = vadd.f32 %v835_v56, %v834_v54  ;;  %v841_v49 = vmul.f32 %v1467_v40, %v1467_v40 }
 0x217   :  { %v654_v51 = vpop.f32.mrb[5].mxu0  ;;  %v842_v1 = vmul.f32 %v1469_v45, %v1469_v45  ;;  %v1499_v11 = vadd.f32 %v652_v48, %v552_v6 }
 0x218   :  { %v656_v52 = vpop.f32.mrb[6].mxu0  ;;  %817 = vadd.xlane.f32.xlu0 %v816_v50  ;;  %v819_v53 = vadd.f32 %v1471_v47, %v1469_v45  ;;  %v843_v2 = vmul.f32 %v1471_v47, %v1471_v47  ;;  %v1501_v12 = vadd.f32 %v654_v51, %v552_v6  ;;  %v860_v13 = vadd.f32 %v841_v49, %v840_v4 }
 0x219   :  { %v658_v57 = vpop.f32.mrb[7].mxu0  ;;  %v1495_v7 = vadd.f32 %v656_v52, %v557_v5  ;;  %v836_v24 = vmul.f32 %v1499_v11, %v1499_v11 }
 0x21a   :  { %v770_v58 = vpop.f32.mrb[4].mxu1  ;;  %820 = vadd.xlane.f32.xlu1 %v819_v53  ;;  %v1497_v8 = vadd.f32 %v658_v57, %v557_v5  ;;  %v863_v9 = vadd.f32 %v843_v2, %v842_v1  ;;  %v810_v21 = vadd.f32 %v1501_v12, %v1499_v11  ;;  %v837_v26 = vmul.f32 %v1501_v12, %v1501_v12 }
 0x21b   :  { %v772_v62 = vpop.f32.mrb[5].mxu1  ;;  %v1509_v17 = vadd.f32 %v770_v58, %v552_v6  ;;  %v838_v23 = vmul.f32 %v1495_v7, %v1495_v7 }
 0x21c   :  { %v774_v63 = vpop.f32.mrb[6].mxu1  ;;  %808 = vadd.xlane.f32.xlu0 %v807_v59  ;;  %v813_v16 = vadd.f32 %v1497_v8, %v1495_v7  ;;  %v1511_v18 = vadd.f32 %v772_v62, %v552_v6  ;;  %v839_v20 = vmul.f32 %v1497_v8, %v1497_v8  ;;  %v854_v29 = vadd.f32 %v837_v26, %v836_v24 }
 0x21d   :  { %v776_v3 = vpop.f32.mrb[7].mxu1  ;;  %v1503_v14 = vadd.f32 %v774_v63, %v557_v5  ;;  %v844_v30 = vmul.f32 %v1509_v17, %v1509_v17 }
 0x21e   :  { %852 = vadd.xlane.f32.xlu1 %v851_v0  ;;  %v1505_v15 = vadd.f32 %v776_v3, %v557_v5  ;;  %v822_v25 = vadd.f32 %v1511_v18, %v1509_v17  ;;  %v857_v19 = vadd.f32 %v839_v20, %v838_v23  ;;  %v845_v31 = vmul.f32 %v1511_v18, %v1511_v18 }
 0x21f   :  { %v846_v27 = vmul.f32 %v1503_v14, %v1503_v14 }
 0x220   :  { %849 = vadd.xlane.f32.xlu0 %v848_v55  ;;  %v825_v22 = vadd.f32 %v1505_v15, %v1503_v14  ;;  %v847_v28 = vmul.f32 %v1505_v15, %v1505_v15  ;;  %v866_v37 = vadd.f32 %v845_v31, %v844_v30  ;;  %v896_v31 = vld [vmem:[%s1592_s4] sm:$0xff] }
 0x222   :  { %864 = vadd.xlane.f32.xlu1 %v863_v9  ;;  %v869_v35 = vadd.f32 %v847_v28, %v846_v27 }
 0x224   :  { %861 = vadd.xlane.f32.xlu0 %v860_v13 }
 0x226   :  { %814 = vadd.xlane.f32.xlu1 %v813_v16 }
 0x228   :  { %811 = vadd.xlane.f32.xlu0 %v810_v21 }
 0x22a   :  { %826 = vadd.xlane.f32.xlu1 %v825_v22 }
 0x22c   :  { %823 = vadd.xlane.f32.xlu0 %v822_v25 }
 0x22e   :  { %858 = vadd.xlane.f32.xlu1 %v857_v19  ;;  %v897_v19 = vld [vmem:[%s1592_s4 + $0x8] sm:$0xff] }
 0x230   :  { %855 = vadd.xlane.f32.xlu0 %v854_v29 }
 0x232   :  { %870 = vadd.xlane.f32.xlu1 %v869_v35 }
 0x234   :  { %867 = vadd.xlane.f32.xlu0 %v866_v37 }
 0x2a1   :  { %v806_v38 = vpop.xlane.xlu1 %805 }
 0x2a5   :  { %v818_v41 = vpop.xlane.xlu0 %817 }
 0x2a6   :  { %v828_v46 = vadd.f32 %v818_v41, %v806_v38 }
 0x2a7   :  { %v821_v42 = vpop.xlane.xlu1 %820 }
 0x2a8   :  { %v876_v52 = vmul.f32 0.001953125, %v828_v46  ;;  %v913_v46 = vld [vmem:[%s1593_s5 + $0x8] sm:$0xff] }
 0x2a9   :  { %v809_v10 = vpop.xlane.xlu0 %808 }
 0x2aa   :  { %v829_v44 = vadd.f32 %v821_v42, %v809_v10  ;;  %v884_v60 = vmul.f32 %v876_v52, %v876_v52 }
 0x2ab   :  { %v853_v39 = vpop.xlane.xlu1 %852 }
 0x2ac   :  { %v877_v50 = vmul.f32 0.001953125, %v829_v44 }
 0x2ad   :  { %v850_v48 = vpop.xlane.xlu0 %849 }
 0x2ae   :  { %v885_v56 = vmul.f32 %v877_v50, %v877_v50 }
 0x2af   :  { %v865_v51 = vpop.xlane.xlu1 %864 }
 0x2b0   :  { %v873_v53 = vadd.f32 %v865_v51, %v853_v39 }
 0x2b1   :  { %v862_v54 = vpop.xlane.xlu0 %861 }
 0x2b2   :  { %v881_v57 = vmul.f32 0.001953125, %v873_v53  ;;  %v872_v58 = vadd.f32 %v862_v54, %v850_v48  ;;  %v912_v48 = vld [vmem:[%s1593_s5] sm:$0xff] }
 0x2b3   :  { %v815_v59 = vpop.xlane.xlu1 %814 }
 0x2b4   :  { %v889_v61 = vsub.f32 %v881_v57, %v885_v56  ;;  %v880_v62 = vmul.f32 0.001953125, %v872_v58  ;;  %v898_v58 = vld [vmem:[%s1592_s4 + $0x10] sm:$0xff] }
 0x2b5   :  { %v812_v63 = vpop.xlane.xlu0 %811 }
 0x2b6   :  { %v893_v0 = vmax.f32 %v889_v61, 0.0  ;;  %v888_v1 = vsub.f32 %v880_v62, %v884_v60 }
 0x2b7   :  { %v827_v2 = vpop.xlane.xlu1 %826 }
 0x2b8   :  { %v901_v3 = vadd.f32 1e-05, %v893_v0  ;;  %v892_v55 = vmax.f32 %v888_v1, 0.0  ;;  %v831_v5 = vadd.f32 %v827_v2, %v815_v59 }
 0x2b9   :  { %v824_v4 = vpop.xlane.xlu0 %823 }
 0x2ba   :  { %1103 = vrsqrt.f32 %v901_v3  ;;  %v900_v49 = vadd.f32 1e-05, %v892_v55  ;;  %v830_v9 = vadd.f32 %v824_v4, %v812_v63  ;;  %v879_v16 = vmul.f32 0.001953125, %v831_v5  ;;  %v914_v63 = vld [vmem:[%s1593_s5 + $0x10] sm:$0xff] }
 0x2bb   :  { %v859_v6 = vpop.xlane.xlu1 %858 }
 0x2bc   :  { %1105 = vrsqrt.f32 %v900_v49  ;;  %v878_v22 = vmul.f32 0.001953125, %v830_v9  ;;  %v887_v25 = vmul.f32 %v879_v16, %v879_v16 }
 0x2bd   :  { %v856_v13 = vpop.xlane.xlu0 %855 }
 0x2be   :  { %v886_v28 = vmul.f32 %v878_v22, %v878_v22 }
 0x2bf   :  { %v871_v21 = vpop.xlane.xlu1 %870 }
 0x2c0   :  { %v875_v23 = vadd.f32 %v871_v21, %v859_v6 }
 0x2c1   :  { %v868_v20 = vpop.xlane.xlu0 %867 }
 0x2c2   :  { %v883_v24 = vmul.f32 0.001953125, %v875_v23  ;;  %v874_v26 = vadd.f32 %v868_v20, %v856_v13 }
 0x2c4   :  { %v1104_v27 = vpop.eup %1103  ;;  %v891_v29 = vsub.f32 %v883_v24, %v887_v25  ;;  %v882_v30 = vmul.f32 0.001953125, %v874_v26 }
 0x2c5   :  { %v909_v35 = vmul.f32 %v1104_v27, %v897_v19 }
 0x2c6   :  { %v1106_v37 = vpop.eup %1105  ;;  %v895_v38 = vmax.f32 %v891_v29, 0.0  ;;  %v890_v41 = vsub.f32 %v882_v30, %v886_v28 }
 0x2c7   :  { %931 = vperm.xlu1 %1080, %v909_v35   ;;  %v908_v42 = vmul.f32 %v1106_v37, %v896_v31  ;;  %v917_v10 = vmul.f32 %v909_v35, %v877_v50  ;;  %v899_v50 = vld [vmem:[%s1592_s4 + $0x18] sm:$0xff]  ;;  %s1142_s4 = smov [#allocation4]  }
 0x2c8   :  { %v903_v44 = vadd.f32 1e-05, %v895_v38  ;;  %v894_v39 = vmax.f32 %v890_v41, 0.0 }
 0x2c9   :  { %926 = vperm.xlu0 %1079, %v908_v42   ;;  %v916_v51 = vmul.f32 %v908_v42, %v876_v52  ;;  %v921_v54 = vsub.f32 %v913_v46, %v917_v10  ;;  %v915_v52 = vld [vmem:[%s1593_s5 + $0x18] sm:$0xff]  ;;  %s1017_s5 = sshll.u32 %s1142_s4, 4  ;;  %s1018_s5 = int_to_ptr.vmem [resolvable:$true] %s1017_s5 }
 0x2ca   :  { %1107 = vrsqrt.f32 %v903_v44  ;;  %v902_v53 = vadd.f32 1e-05, %v894_v39  ;;  %s1111_s12 = scalar_lea.vmem %s1018_s5, 2048  ;;  %p1116_p1 = scmp.lt.s32.totalorder %s1018_s5, %s1018_s5 }
 0x2cb   :  { %v920_v56 = vsub.f32 %v912_v48, %v916_v51  ;;  %p1112_p0 = scmp.ne.s32.totalorder %s1018_s5, %s1111_s12  ;;  %p1117_p2 = scmp.lt.s32.totalorder %s1111_s12, %s1111_s12 }
 0x2cc   :  { %1109 = vrsqrt.f32 %v902_v53 }
 0x2cd   :  { %967 = vperm.xlu0 %1079, %v921_v54   ;;  %962 = vperm.xlu1 %1080, %v920_v56   ;;  %p1118_p3 = por %p1117_p2, %p1116_p1 }
 0x2cf   :  { %p1119_p4 = pnand %p1118_p3, %p1112_p0 }
 0x2d4   :  { %v1108_v57 = vpop.eup %1107 }
 0x2d5   :  { %v911_v59 = vmul.f32 %v1108_v57, %v899_v50 }
 0x2d6   :  { %v1110_v60 = vpop.eup %1109 }
 0x2d7   :  { %941 = vperm.xlu0 %1079, %v911_v59   ;;  %v910_v61 = vmul.f32 %v1110_v60, %v898_v58  ;;  %v919_v62 = vmul.f32 %v911_v59, %v879_v16 }
 0x2d9   :  { %936 = vperm.xlu1 %1080, %v910_v61   ;;  %v923_v0 = vsub.f32 %v915_v52, %v919_v62  ;;  %v918_v1 = vmul.f32 %v910_v61, %v878_v22 }
 0x2db   :  { %977 = vperm.xlu0 %1079, %v923_v0   ;;  %v922_v2 = vsub.f32 %v914_v63, %v918_v1 }
 0x2dd   :  { %972 = vperm.xlu1 %1080, %v922_v2  }
 0x346   :  { %v932_v3 = vpop.permute.xlu1 %931 }
 0x347   :  { %v946_v9 = vmul.f32 %v932_v3, %v1463_v34  ;;  %v947_v13 = vmul.f32 %v932_v3, %v1465_v33  ;;  %v954_v16 = vmul.f32 %v932_v3, %v1469_v45  ;;  %v955_v21 = vmul.f32 %v932_v3, %v1471_v47 }
 0x348   :  { %v927_v55 = vpop.permute.xlu0 %926 }
 0x349   :  { %v944_v4 = vmul.f32 %v927_v55, %v1455_v32  ;;  %v945_v49 = vmul.f32 %v927_v55, %v1457_v36  ;;  %v952_v5 = vmul.f32 %v927_v55, %v1461_v43  ;;  %v953_v6 = vmul.f32 %v927_v55, %v1467_v40 }
 0x34c   :  { %v963_v22 = vpop.permute.xlu1 %962  ;;  %v968_v23 = vpop.permute.xlu0 %967 }
 0x34d   :  { %v980_v20 = vadd.f32 %v963_v22, %v944_v4  ;;  %v981_v25 = vadd.f32 %v963_v22, %v945_v49  ;;  %v988_v24 = vadd.f32 %v963_v22, %v952_v5  ;;  %v989_v32 = vadd.f32 %v963_v22, %v953_v6 }
 0x34e   :  { %v982_v26 = vadd.f32 %v968_v23, %v946_v9  ;;  %v983_v36 = vadd.f32 %v968_v23, %v947_v13  ;;  %v990_v19 = vadd.f32 %v968_v23, %v954_v16  ;;  %v991_v43 = vadd.f32 %v968_v23, %v955_v21 }
 0x34f   :  { %996 = vst [vmem:[#allocation4] sm:$0xff] %v980_v20  ;;  %997 = vst [vmem:[#allocation4 + $0x8] sm:$0xff] %v981_v25 }
 0x350   :  { %1004 = vst [vmem:[#allocation4 + $0x40] sm:$0xff] %v988_v24  ;;  %1005 = vst [vmem:[#allocation4 + $0x48] sm:$0xff] %v989_v32 }
 0x351   :  { %998 = vst [vmem:[#allocation4 + $0x10] sm:$0xff] %v982_v26  ;;  %999 = vst [vmem:[#allocation4 + $0x18] sm:$0xff] %v983_v36 }
 0x352   :  { %1006 = vst [vmem:[#allocation4 + $0x50] sm:$0xff] %v990_v19  ;;  %1007 = vst [vmem:[#allocation4 + $0x58] sm:$0xff] %v991_v43 }
 0x356   :  { %v942_v34 = vpop.permute.xlu0 %941 }
 0x357   :  { %v950_v40 = vmul.f32 %v942_v34, %v1495_v7  ;;  %v951_v45 = vmul.f32 %v942_v34, %v1497_v8  ;;  %v958_v47 = vmul.f32 %v942_v34, %v1503_v14  ;;  %v959_v27 = vmul.f32 %v942_v34, %v1505_v15 }
 0x358   :  { %v937_v33 = vpop.permute.xlu1 %936 }
 0x359   :  { %v948_v29 = vmul.f32 %v937_v33, %v1499_v11  ;;  %v949_v30 = vmul.f32 %v937_v33, %v1501_v12  ;;  %v956_v31 = vmul.f32 %v937_v33, %v1509_v17  ;;  %v957_v35 = vmul.f32 %v937_v33, %v1511_v18 }
 0x35a   :  { %v978_v28 = vpop.permute.xlu0 %977 }
 0x35b   :  { %v986_v37 = vadd.f32 %v978_v28, %v950_v40  ;;  %v987_v38 = vadd.f32 %v978_v28, %v951_v45  ;;  %v994_v7 = vadd.f32 %v978_v28, %v958_v47  ;;  %v995_v41 = vadd.f32 %v978_v28, %v959_v27 }
 0x35c   :  { %v973_v8 = vpop.permute.xlu1 %972 }
 0x35d   :  { %1002 = vst [vmem:[#allocation4 + $0x30] sm:$0xff] %v986_v37  ;;  %1003 = vst [vmem:[#allocation4 + $0x38] sm:$0xff] %v987_v38  ;;  %v984_v14 = vadd.f32 %v973_v8, %v948_v29  ;;  %v985_v15 = vadd.f32 %v973_v8, %v949_v30  ;;  %v992_v11 = vadd.f32 %v973_v8, %v956_v31 }
 0x35e   :  { %1010 = vst [vmem:[#allocation4 + $0x70] sm:$0xff] %v994_v7  ;;  %1011 = vst [vmem:[#allocation4 + $0x78] sm:$0xff] %v995_v41  ;;  %v993_v42 = vadd.f32 %v973_v8, %v957_v35 }
 0x35f   :  { %1000 = vst [vmem:[#allocation4 + $0x20] sm:$0xff] %v984_v14  ;;  %1001 = vst [vmem:[#allocation4 + $0x28] sm:$0xff] %v985_v15 }
 0x360   :  { %1008 = vst [vmem:[#allocation4 + $0x60] sm:$0xff] %v992_v11  ;;  %1009 = vst [vmem:[#allocation4 + $0x68] sm:$0xff] %v993_v42 }
 0x361   :  { %1122 = shalt.err (!%p1119_p4)
}
 0x362   :  { %s1123_s3 = scalar_lea.hbm %s1594_s6, 2048 }
 0x363   :  { %p1124_p5 = scmp.ne.s32.totalorder %s1594_s6, %s1123_s3  ;;  %p1127_p6 = scmp.lt.u32.totalorder %s1123_s3, %s1594_s6 }
 0x365   :  { %p1129_p7 = pnand %p1127_p6, %p1124_p5 }
 0x367   :  { %1132 = shalt.err (!%p1129_p7)
}
 0x368   :  { %s1143_s19 = smov 256  }
 0x369   :  { %1023 = dma.vmem_to_hbm [thread:$0]  %s1018_s5, 2048, %s1594_s6, [#allocation5], %s1143_s19, %s1143_s19, %s1135_s25  }
 0x36a   :  { %1133 = dma.done.wait [#allocation5], 2048  }
 0x36b   :  { %1134 = vsyncadd [#allocation5], 4294965248 }
 0x36c   :  { %1027 = vsyncpa [#allocation5], 1 }

</bundles_post_ra>
